<compile_context>
chip_gen: v7x
topology: tpu7x:2x2x1
jax: 0.10.0
libtpu: 0.0.40
codegen_flags: <defaults>
</compile_context>

<pallas_src>
import functools

import jax
import jax.numpy as jnp
from jax.experimental import pallas as pl
from jax.experimental.pallas import tpu as pltpu


# ----------------------------------------------------------------------------
# helpers
# ----------------------------------------------------------------------------
def _round_up(x, m):
    return ((x + m - 1) // m) * m


def _choose_tiles(n):
    """Pick (n_pad, row_tile tm, k_tile tk) for the (N x 2N) aggregation matmul.

    n_pad is padded to a multiple of the row tile so tm/tk never collapse to
    tiny tiles; tm keeps >= 2 row grid steps (v7x megacore); tk up to 2048.
    """
    if n <= 256:
        # tiny graph: one full-extent block; 16-row multiple for bf16 packing
        n_pad = _round_up(n, 16)
        return n_pad, n_pad, 2 * n_pad
    n_pad = _round_up(n, 512)
    tm = next(t for t in (1024, 512, 256) if n_pad % t == 0 and n_pad // t >= 2)
    two_n = 2 * n_pad
    tk = next(t for t in (2048, 1024) if two_n % t == 0)
    return n_pad, tm, tk


# ----------------------------------------------------------------------------
# kernel 1: fused per-node projections
#   one wide matmul X @ [W0 | W1 | Wr] -> P0, P1 (bf16) and R = X@Wr + b (f32)
# ----------------------------------------------------------------------------
def _project_kernel(x_ref, w_ref, b_ref, pcat_ref, r_ref):
    y = jnp.dot(x_ref[...], w_ref[...], preferred_element_type=jnp.float32)
    c = r_ref.shape[1]                       # cout (multiple of 128 -> aligned)
    pcat_ref[0] = y[:, :c].astype(pcat_ref.dtype)
    pcat_ref[1] = y[:, c:2 * c].astype(pcat_ref.dtype)
    r_ref[...] = (y[:, 2 * c:] + b_ref[...]).astype(r_ref.dtype)


def _project(x, w_cat, b, tm):
    n_pad, cin = x.shape
    cout = w_cat.shape[1] // 3
    return pl.pallas_call(
        _project_kernel,
        out_shape=(jax.ShapeDtypeStruct((2, n_pad, cout), jnp.bfloat16),
                   jax.ShapeDtypeStruct((n_pad, cout), jnp.float32)),
        grid_spec=pltpu.PrefetchScalarGridSpec(
            num_scalar_prefetch=0,
            grid=(n_pad // tm,),
            in_specs=[pl.BlockSpec((tm, cin), lambda i: (i, 0)),
                      pl.BlockSpec((cin, 3 * cout), lambda i: (0, 0)),
                      pl.BlockSpec((1, cout), lambda i: (0, 0))],
            out_specs=[pl.BlockSpec((2, tm, cout), lambda i: (0, i, 0)),
                       pl.BlockSpec((tm, cout), lambda i: (i, 0))]),
        compiler_params=pltpu.CompilerParams(
            dimension_semantics=("parallel",),
            vmem_limit_bytes=32 * 1024 * 1024),
    )(x, w_cat, b)


# ----------------------------------------------------------------------------
# kernel 2: tiled aggregation
#   out = (Acat @ Pcat) * deg_inv + R   (+ fused ELU / log_softmax epilogue)
# ----------------------------------------------------------------------------
def _aggregate_kernel(acat_ref, pcat_ref, r_ref, deg_ref, out_ref, acc_ref, *,
                      activation, num_valid_cols):
    k = pl.program_id(1)

    @pl.when(k == 0)
    def _():
        acc_ref[...] = jnp.zeros_like(acc_ref)

    acc_ref[...] += jnp.dot(acat_ref[...], pcat_ref[...],
                            preferred_element_type=jnp.float32)

    @pl.when(k == pl.num_programs(1) - 1)
    def _():
        # mean aggregation: apply 1/deg in f32 here (keeps Acat entries in [0,1])
        y = acc_ref[...] * deg_ref[...] + r_ref[...]
        if activation == "elu":
            # ELU(alpha=1) without exp-overflow: exp(min(y,0)) - 1
            y = jnp.where(y > 0, y, jnp.exp(jnp.minimum(y, 0.0)) - 1.0)
        elif activation == "log_softmax":
            lane = jax.lax.broadcasted_iota(jnp.int32, y.shape, 1)
            y = jnp.where(lane < num_valid_cols, y, jnp.float32(-1e30))
            m = jnp.max(y, axis=1, keepdims=True)
            s = y - m
            lse = jnp.log(jnp.sum(jnp.exp(s), axis=1, keepdims=True))
            y = s - lse
        out_ref[...] = y.astype(out_ref.dtype)


def _aggregate(acat, pcat, r, deg_inv, tm, tk, *, activation, out_dtype,
               num_valid_cols):
    n_pad, two_n = acat.shape
    cout = pcat.shape[1]
    kernel = functools.partial(_aggregate_kernel, activation=activation,
                               num_valid_cols=num_valid_cols)
    flops = int(2 * n_pad * two_n * cout + 3 * n_pad * cout)
    bytes_accessed = int(acat.size * acat.dtype.itemsize
                         + pcat.size * pcat.dtype.itemsize
                         + r.size * 4 + deg_inv.size * 4
                         + n_pad * cout * jnp.dtype(out_dtype).itemsize)
    return pl.pallas_call(
        kernel,
        out_shape=jax.ShapeDtypeStruct((n_pad, cout), out_dtype),
        grid_spec=pltpu.PrefetchScalarGridSpec(
            num_scalar_prefetch=0,
            grid=(n_pad // tm, two_n // tk),
            in_specs=[pl.BlockSpec((tm, tk), lambda i, k: (i, k)),
                      pl.BlockSpec((tk, cout), lambda i, k: (k, 0)),
                      pl.BlockSpec((tm, cout), lambda i, k: (i, 0)),
                      pl.BlockSpec((tm, 1), lambda i, k: (i, 0))],
            out_specs=pl.BlockSpec((tm, cout), lambda i, k: (i, 0)),
            scratch_shapes=[pltpu.VMEM((tm, cout), jnp.float32)]),
        compiler_params=pltpu.CompilerParams(
            dimension_semantics=("parallel", "arbitrary"),
            vmem_limit_bytes=32 * 1024 * 1024),
        cost_estimate=pl.CostEstimate(flops=flops,
                                      transcendentals=int(n_pad * cout),
                                      bytes_accessed=bytes_accessed),
    )(acat, pcat, r, deg_inv)


# ----------------------------------------------------------------------------
# plain-JAX glue: fused aggregation matrix Acat = [A0 | A1] (bf16, one scatter)
# and f32 inverse-degree column (mean normalization applied in-kernel).
# ----------------------------------------------------------------------------
def build_fused_aggregation_matrix(edge_index, edge_attr, n_pad):
    src = edge_index[0]                      # j : messages flow j -> i
    dst = edge_index[1]                      # i
    u = edge_attr[:, 0].astype(jnp.float32)  # pseudo coordinate in [0, 1]
    # degree-1 open B-spline basis, kernel_size=2: B0 = 1-u (W0), B1 = u (W1)
    rows = jnp.concatenate([dst, dst])
    cols = jnp.concatenate([src, n_pad + src])
    vals = jnp.concatenate([1.0 - u, u]).astype(jnp.bfloat16)
    acat = jnp.zeros((n_pad, 2 * n_pad), jnp.bfloat16).at[rows, cols].add(vals)
    deg = jnp.zeros((n_pad,), jnp.float32).at[dst].add(1.0)
    deg_inv = jnp.where(deg > 0, 1.0 / deg, 0.0).reshape(n_pad, 1)
    return acat, deg_inv


# ----------------------------------------------------------------------------
# forward pass
# ----------------------------------------------------------------------------
def spline_cnn_forward(x, edge_index, edge_attr, params):
    (w0_1, w1_1, wr_1, b1, w0_2, w1_2, wr_2, b2) = params
    n, f = x.shape
    nhid = w0_1.shape[1]
    num_classes = w0_2.shape[1]

    n_pad, tm, tk = _choose_tiles(n)
    f_pad = _round_up(f, 128)
    h_pad = _round_up(nhid, 128)
    c_pad = _round_up(num_classes, 128)

    # TODO(synk): for a static graph, hoist acat/deg_inv out of the forward and
    #             cache across calls (the build dominates steady-state glue).
    acat, deg_inv = build_fused_aggregation_matrix(edge_index, edge_attr, n_pad)

    def pad_w(w, rows, cols):
        return (jnp.zeros((rows, cols), jnp.bfloat16)
                .at[:w.shape[0], :w.shape[1]].set(w.astype(jnp.bfloat16)))

    def pad_b(b, cols):
        b = b.reshape(1, -1).astype(jnp.float32)
        return jnp.zeros((1, cols), jnp.float32).at[:, :b.shape[1]].set(b)

    x_pad = (jnp.zeros((n_pad, f_pad), jnp.bfloat16)
             .at[:n, :f].set(x.astype(jnp.bfloat16)))

    # ---- SplineConv layer 1 (+ fused ELU); dropout is identity in eval ----
    wcat1 = jnp.concatenate([pad_w(w0_1, f_pad, h_pad),
                             pad_w(w1_1, f_pad, h_pad),
                             pad_w(wr_1, f_pad, h_pad)], axis=1)
    p1, r1 = _project(x_pad, wcat1, pad_b(b1, h_pad), tm)
    pcat1 = p1.reshape(2 * n_pad, h_pad)       # contiguous reshape -> no copy
    h = _aggregate(acat, pcat1, r1, deg_inv, tm, tk, activation="elu",
                   out_dtype=jnp.bfloat16, num_valid_cols=nhid)

    # ---- SplineConv layer 2 (+ fused log_softmax) ----
    wcat2 = jnp.concatenate([pad_w(w0_2, h_pad, c_pad),
                             pad_w(w1_2, h_pad, c_pad),
                             pad_w(wr_2, h_pad, c_pad)], axis=1)
    p2, r2 = _project(h, wcat2, pad_b(b2, c_pad), tm)
    pcat2 = p2.reshape(2 * n_pad, c_pad)
    y = _aggregate(acat, pcat2, r2, deg_inv, tm, tk, activation="log_softmax",
                   out_dtype=jnp.float32, num_valid_cols=num_classes)

    return y[:n, :num_classes]


# ----------------------------------------------------------------------------
# parameter init (matches the PyTorch module's parameter structure)
# ----------------------------------------------------------------------------
def init_params(key, num_features, nhid, num_classes):
    ks = jax.random.split(key, 8)

    def lin(k, fan_in, fan_out):
        bound = 1.0 / jnp.sqrt(float(fan_in))
        return jax.random.uniform(k, (fan_in, fan_out), jnp.float32, -bound, bound)

    # conv1: weight (2, F, H) split into W0, W1; root Linear(F, H); bias (H,)
    w0_1 = lin(ks[0], num_features, nhid)
    w1_1 = lin(ks[1], num_features, nhid)
    wr_1 = lin(ks[2], num_features, nhid)
    b1 = jax.random.uniform(ks[3], (1, nhid), jnp.float32, -0.1, 0.1)
    # conv2: weight (2, H, C); root Linear(H, C); bias (C,)
    w0_2 = lin(ks[4], nhid, num_classes)
    w1_2 = lin(ks[5], nhid, num_classes)
    wr_2 = lin(ks[6], nhid, num_classes)
    b2 = jax.random.uniform(ks[7], (1, num_classes), jnp.float32, -0.1, 0.1)
    return (w0_1, w1_1, wr_1, b1, w0_2, w1_2, wr_2, b2)


if __name__ == "__main__":
    key = jax.random.PRNGKey(0)
    k_x, k_ei, k_ea, k_p = jax.random.split(key, 4)

    num_nodes = 16
    num_features = 4
    nhid = 32
    num_classes = 4
    num_edges = 48

    x = jax.random.normal(k_x, (num_nodes, num_features), jnp.float32)
    edge_index = jax.random.randint(k_ei, (2, num_edges), 0, num_nodes, jnp.int32)
    edge_attr = jax.random.uniform(k_ea, (num_edges, 1), jnp.float32)  # pseudo in [0,1]

    params = init_params(k_p, num_features, nhid, num_classes)

    fwd = jax.jit(spline_cnn_forward)
    out = fwd(x, edge_index, edge_attr, params)
    jax.block_until_ready(out)

    assert out.shape == (num_nodes, num_classes)
    assert bool(jnp.all(jnp.isfinite(out)))
    # log_softmax rows must be normalized
    probs = jnp.exp(out)
    assert bool(jnp.all(jnp.abs(probs.sum(axis=1) - 1.0) < 1e-2))
    print("KERNEL_OK")
</pallas_src>

<mosaic_0001>
module attributes {stable_mosaic.version = 11 : i64} {
  func.func private @main(%arg0: i32) attributes {dimension_semantics = [#tpu.dimension_semantics<core_parallel>], iteration_bounds = array<i64: 2>, tpu.core_type = #tpu.core_type<sc_scalar_subcore>, window_params = []} {
    return
  }
}

module attributes {stable_mosaic.version = 11 : i64} {
  func.func private @main(%arg0: i32) attributes {dimension_semantics = [#tpu.dimension_semantics<core_parallel>], iteration_bounds = array<i64: 2>, tpu.core_type = #tpu.core_type<sc_scalar_subcore>, window_params = []} {
    return
  }
}

module attributes {stable_mosaic.version = 11 : i64} {
  func.func @_project_kernel(%arg0: i32, %arg1: memref<16x128xbf16, #tpu.memory_space<vmem>>, %arg2: memref<128x384xbf16, #tpu.memory_space<vmem>>, %arg3: memref<1x128xf32, #tpu.memory_space<vmem>>, %arg4: memref<2x16x128xbf16, #tpu.memory_space<vmem>>, %arg5: memref<16x128xf32, #tpu.memory_space<vmem>>) attributes {dimension_semantics = [#tpu.dimension_semantics<parallel>], iteration_bounds = array<i64: 1>, scalar_prefetch = 0 : i64, scratch_operands = 0 : i64, tpu.core_type = #tpu.core_type<tc>, window_params = [{transform_indices = @transform_0, window_bounds = array<i64: 16, 128>}, {pipeline_mode = #tpu.pipeline_mode<synchronous>, transform_indices = @transform_1, window_bounds = array<i64: 128, 384>}, {pipeline_mode = #tpu.pipeline_mode<synchronous>, transform_indices = @transform_2, window_bounds = array<i64: 1, 128>}, {transform_indices = @transform_3, window_bounds = array<i64: 2, 16, 128>}, {transform_indices = @transform_4, window_bounds = array<i64: 16, 128>}]} {
    %c0 = arith.constant 0 : index
    %c0_0 = arith.constant 0 : index
    %0 = vector.load %arg1[%c0, %c0_0] : memref<16x128xbf16, #tpu.memory_space<vmem>>, vector<16x128xbf16>
    %c0_1 = arith.constant 0 : index
    %c0_2 = arith.constant 0 : index
    %1 = vector.load %arg2[%c0_1, %c0_2] : memref<128x384xbf16, #tpu.memory_space<vmem>>, vector<128x384xbf16>
    %cst = arith.constant dense<0.000000e+00> : vector<16x384xf32>
    %2 = tpu.matmul %0, %1, %cst {dimension_numbers = #tpu.dot_dimension_numbers<[1], [0], [0], [1], [0, 0, 1, 1], [], []>} : vector<16x128xbf16>, vector<128x384xbf16>, vector<16x384xf32> -> vector<16x384xf32>
    %3 = vector.extract_strided_slice %2 {offsets = [0, 0], sizes = [16, 128], strides = [1, 1]} : vector<16x384xf32> to vector<16x128xf32>
    %4 = arith.truncf %3 : vector<16x128xf32> to vector<16x128xbf16>
    %c0_3 = arith.constant 0 : index
    %c0_4 = arith.constant 0 : index
    %c0_5 = arith.constant 0 : index
    %5 = vector.load %arg4[%c0_3, %c0_4, %c0_5] : memref<2x16x128xbf16, #tpu.memory_space<vmem>>, vector<1x16x128xbf16>
    %6 = vector.shape_cast %5 : vector<1x16x128xbf16> to vector<16x128xbf16>
    %7 = vector.shape_cast %4 : vector<16x128xbf16> to vector<1x16x128xbf16>
    tpu.vector_store %arg4[%c0_3, %c0_4, %c0_5], %7 {strides = array<i32>} : memref<2x16x128xbf16, #tpu.memory_space<vmem>>, vector<1x16x128xbf16>,
    %8 = vector.extract_strided_slice %2 {offsets = [0, 128], sizes = [16, 128], strides = [1, 1]} : vector<16x384xf32> to vector<16x128xf32>
    %9 = arith.truncf %8 : vector<16x128xf32> to vector<16x128xbf16>
    %c1 = arith.constant 1 : index
    %c0_6 = arith.constant 0 : index
    %c0_7 = arith.constant 0 : index
    %10 = vector.load %arg4[%c1, %c0_6, %c0_7] : memref<2x16x128xbf16, #tpu.memory_space<vmem>>, vector<1x16x128xbf16>
    %11 = vector.shape_cast %10 : vector<1x16x128xbf16> to vector<16x128xbf16>
    %12 = vector.shape_cast %9 : vector<16x128xbf16> to vector<1x16x128xbf16>
    tpu.vector_store %arg4[%c1, %c0_6, %c0_7], %12 {strides = array<i32>} : memref<2x16x128xbf16, #tpu.memory_space<vmem>>, vector<1x16x128xbf16>,
    %13 = vector.extract_strided_slice %2 {offsets = [0, 256], sizes = [16, 128], strides = [1, 1]} : vector<16x384xf32> to vector<16x128xf32>
    %c0_8 = arith.constant 0 : index
    %c0_9 = arith.constant 0 : index
    %14 = vector.load %arg3[%c0_8, %c0_9] : memref<1x128xf32, #tpu.memory_space<vmem>>, vector<1x128xf32>
    %15 = vector.broadcast %14 : vector<1x128xf32> to vector<16x128xf32>
    %16 = arith.addf %13, %15 : vector<16x128xf32>
    %c0_10 = arith.constant 0 : index
    %c0_11 = arith.constant 0 : index
    %17 = vector.load %arg5[%c0_10, %c0_11] : memref<16x128xf32, #tpu.memory_space<vmem>>, vector<16x128xf32>
    tpu.vector_store %arg5[%c0_10, %c0_11], %16 {strides = array<i32>} : memref<16x128xf32, #tpu.memory_space<vmem>>, vector<16x128xf32>,
    return
  }
  func.func @transform_0(%arg0: i32) -> (i32, i32) {
    %c0_i32 = arith.constant 0 : i32
    %c0_i32_0 = arith.constant 0 : i32
    return %arg0, %c0_i32 : i32, i32
  }
  func.func @transform_1(%arg0: i32) -> (i32, i32) {
    %c0_i32 = arith.constant 0 : i32
    %c0_i32_0 = arith.constant 0 : i32
    %c0_i32_1 = arith.constant 0 : i32
    return %c0_i32, %c0_i32_0 : i32, i32
  }
  func.func @transform_2(%arg0: i32) -> (i32, i32) {
    %c0_i32 = arith.constant 0 : i32
    %c0_i32_0 = arith.constant 0 : i32
    %c0_i32_1 = arith.constant 0 : i32
    return %c0_i32, %c0_i32_0 : i32, i32
  }
  func.func @transform_3(%arg0: i32) -> (i32, i32, i32) {
    %c0_i32 = arith.constant 0 : i32
    %c0_i32_0 = arith.constant 0 : i32
    %c0_i32_1 = arith.constant 0 : i32
    return %c0_i32, %arg0, %c0_i32_0 : i32, i32, i32
  }
  func.func @transform_4(%arg0: i32) -> (i32, i32) {
    %c0_i32 = arith.constant 0 : i32
    %c0_i32_0 = arith.constant 0 : i32
    return %arg0, %c0_i32 : i32, i32
  }
}

module attributes {stable_mosaic.version = 11 : i64} {
  func.func @_aggregate_kernel(%arg0: i32, %arg1: i32, %arg2: memref<16x32xbf16, #tpu.memory_space<vmem>>, %arg3: memref<32x128xbf16, #tpu.memory_space<vmem>>, %arg4: memref<16x128xf32, #tpu.memory_space<vmem>>, %arg5: memref<16x1xf32, #tpu.memory_space<vmem>>, %arg6: memref<16x128xf32, #tpu.memory_space<vmem>>, %arg7: memref<16x128xf32, #tpu.memory_space<vmem>>) attributes {dimension_semantics = [#tpu.dimension_semantics<parallel>, #tpu.dimension_semantics<arbitrary>], iteration_bounds = array<i64: 1, 1>, scalar_prefetch = 0 : i64, scratch_operands = 1 : i64, tpu.core_type = #tpu.core_type<tc>, window_params = [{transform_indices = @transform_0, window_bounds = array<i64: 16, 32>}, {transform_indices = @transform_1, window_bounds = array<i64: 32, 128>}, {transform_indices = @transform_2, window_bounds = array<i64: 16, 128>}, {transform_indices = @transform_3, window_bounds = array<i64: 16, 1>}, {transform_indices = @transform_4, window_bounds = array<i64: 16, 128>}]} {
    %c0_i32 = arith.constant 0 : i32
    %0 = arith.cmpi eq, %arg1, %c0_i32 : i32
    %1 = arith.extui %0 : i1 to i32
    %c0_i32_0 = arith.constant 0 : i32
    %2 = arith.cmpi ne, %1, %c0_i32_0 : i32
    scf.if %2 {
      %cst_10 = arith.constant 0.000000e+00 : f32
      %12 = vector.broadcast %cst_10 : f32 to vector<16x128xf32>
      %c0_11 = arith.constant 0 : index
      %c0_12 = arith.constant 0 : index
      %13 = vector.load %arg7[%c0_11, %c0_12] : memref<16x128xf32, #tpu.memory_space<vmem>>, vector<16x128xf32>
      tpu.vector_store %arg7[%c0_11, %c0_12], %12 {strides = array<i32>} : memref<16x128xf32, #tpu.memory_space<vmem>>, vector<16x128xf32>,
    } else {
    }
    %c0 = arith.constant 0 : index
    %c0_1 = arith.constant 0 : index
    %3 = vector.load %arg7[%c0, %c0_1] : memref<16x128xf32, #tpu.memory_space<vmem>>, vector<16x128xf32>
    %c0_2 = arith.constant 0 : index
    %c0_3 = arith.constant 0 : index
    %4 = vector.load %arg2[%c0_2, %c0_3] : memref<16x32xbf16, #tpu.memory_space<vmem>>, vector<16x32xbf16>
    %c0_4 = arith.constant 0 : index
    %c0_5 = arith.constant 0 : index
    %5 = vector.load %arg3[%c0_4, %c0_5] : memref<32x128xbf16, #tpu.memory_space<vmem>>, vector<32x128xbf16>
    %cst = arith.constant dense<0.000000e+00> : vector<16x128xf32>
    %6 = tpu.matmul %4, %5, %cst {dimension_numbers = #tpu.dot_dimension_numbers<[1], [0], [0], [1], [0, 0, 1, 1], [], []>} : vector<16x32xbf16>, vector<32x128xbf16>, vector<16x128xf32> -> vector<16x128xf32>
    %7 = arith.addf %3, %6 : vector<16x128xf32>
    %c0_6 = arith.constant 0 : index
    %c0_7 = arith.constant 0 : index
    %8 = vector.load %arg7[%c0_6, %c0_7] : memref<16x128xf32, #tpu.memory_space<vmem>>, vector<16x128xf32>
    tpu.vector_store %arg7[%c0_6, %c0_7], %7 {strides = array<i32>} : memref<16x128xf32, #tpu.memory_space<vmem>>, vector<16x128xf32>,
    %c0_i32_8 = arith.constant 0 : i32
    %9 = arith.cmpi eq, %arg1, %c0_i32_8 : i32
    %10 = arith.extui %9 : i1 to i32
    %c0_i32_9 = arith.constant 0 : i32
    %11 = arith.cmpi ne, %10, %c0_i32_9 : i32
    scf.if %11 {
      %c0_10 = arith.constant 0 : index
      %c0_11 = arith.constant 0 : index
      %12 = vector.load %arg7[%c0_10, %c0_11] : memref<16x128xf32, #tpu.memory_space<vmem>>, vector<16x128xf32>
      %c0_12 = arith.constant 0 : index
      %c0_13 = arith.constant 0 : index
      %13 = vector.load %arg5[%c0_12, %c0_13] : memref<16x1xf32, #tpu.memory_space<vmem>>, vector<16x1xf32>
      %14 = vector.broadcast %13 : vector<16x1xf32> to vector<16x128xf32>
      %15 = arith.mulf %12, %14 : vector<16x128xf32>
      %c0_14 = arith.constant 0 : index
      %c0_15 = arith.constant 0 : index
      %16 = vector.load %arg4[%c0_14, %c0_15] : memref<16x128xf32, #tpu.memory_space<vmem>>, vector<16x128xf32>
      %17 = arith.addf %15, %16 : vector<16x128xf32>
      %18 = tpu.iota {dimensions = array<i32: 1>} : vector<16x128xi32>
      %c4_i32 = arith.constant 4 : i32
      %19 = vector.broadcast %c4_i32 : i32 to vector<16x128xi32>
      %20 = arith.cmpi slt, %18, %19 : vector<16x128xi32>
      %cst_16 = arith.constant -1.000000e+30 : f32
      %21 = vector.broadcast %cst_16 : f32 to vector<16x128xf32>
      %22 = arith.select %20, %17, %21 : vector<16x128xi1>, vector<16x128xf32>
      %cst_17 = arith.constant dense<0xFF800000> : vector<16xf32>
      %23 = vector.multi_reduction <maximumf>, %22, %cst_17 [1] : vector<16x128xf32> to vector<16xf32>
      %24 = vector.shape_cast %23 : vector<16xf32> to vector<16x1xf32>
      %25 = vector.broadcast %24 : vector<16x1xf32> to vector<16x128xf32>
      %26 = arith.subf %22, %25 : vector<16x128xf32>
      %27 = math.exp %26 : vector<16x128xf32>
      %cst_18 = arith.constant dense<0.000000e+00> : vector<16xf32>
      %28 = vector.multi_reduction <add>, %27, %cst_18 [1] : vector<16x128xf32> to vector<16xf32>
      %29 = vector.shape_cast %28 : vector<16xf32> to vector<16x1xf32>
      %30 = math.log %29 : vector<16x1xf32>
      %31 = vector.broadcast %30 : vector<16x1xf32> to vector<16x128xf32>
      %32 = arith.subf %26, %31 : vector<16x128xf32>
      %c0_19 = arith.constant 0 : index
      %c0_20 = arith.constant 0 : index
      %33 = vector.load %arg6[%c0_19, %c0_20] : memref<16x128xf32, #tpu.memory_space<vmem>>, vector<16x128xf32>
      tpu.vector_store %arg6[%c0_19, %c0_20], %32 {strides = array<i32>} : memref<16x128xf32, #tpu.memory_space<vmem>>, vector<16x128xf32>,
    } else {
    }
    return
  }
  func.func @transform_0(%arg0: i32, %arg1: i32) -> (i32, i32) {
    %c0_i32 = arith.constant 0 : i32
    return %arg0, %arg1 : i32, i32
  }
  func.func @transform_1(%arg0: i32, %arg1: i32) -> (i32, i32) {
    %c0_i32 = arith.constant 0 : i32
    %c0_i32_0 = arith.constant 0 : i32
    return %arg1, %c0_i32 : i32, i32
  }
  func.func @transform_2(%arg0: i32, %arg1: i32) -> (i32, i32) {
    %c0_i32 = arith.constant 0 : i32
    %c0_i32_0 = arith.constant 0 : i32
    return %arg0, %c0_i32 : i32, i32
  }
  func.func @transform_3(%arg0: i32, %arg1: i32) -> (i32, i32) {
    %c0_i32 = arith.constant 0 : i32
    %c0_i32_0 = arith.constant 0 : i32
    return %arg0, %c0_i32 : i32, i32
  }
  func.func @transform_4(%arg0: i32, %arg1: i32) -> (i32, i32) {
    %c0_i32 = arith.constant 0 : i32
    %c0_i32_0 = arith.constant 0 : i32
    return %arg0, %c0_i32 : i32, i32
  }
}

module attributes {stable_mosaic.version = 11 : i64} {
  func.func @_aggregate_kernel(%arg0: i32, %arg1: i32, %arg2: memref<16x32xbf16, #tpu.memory_space<vmem>>, %arg3: memref<32x128xbf16, #tpu.memory_space<vmem>>, %arg4: memref<16x128xf32, #tpu.memory_space<vmem>>, %arg5: memref<16x1xf32, #tpu.memory_space<vmem>>, %arg6: memref<16x128xbf16, #tpu.memory_space<vmem>>, %arg7: memref<16x128xf32, #tpu.memory_space<vmem>>) attributes {dimension_semantics = [#tpu.dimension_semantics<parallel>, #tpu.dimension_semantics<arbitrary>], iteration_bounds = array<i64: 1, 1>, scalar_prefetch = 0 : i64, scratch_operands = 1 : i64, tpu.core_type = #tpu.core_type<tc>, window_params = [{transform_indices = @transform_0, window_bounds = array<i64: 16, 32>}, {transform_indices = @transform_1, window_bounds = array<i64: 32, 128>}, {transform_indices = @transform_2, window_bounds = array<i64: 16, 128>}, {transform_indices = @transform_3, window_bounds = array<i64: 16, 1>}, {transform_indices = @transform_4, window_bounds = array<i64: 16, 128>}]} {
    %c0_i32 = arith.constant 0 : i32
    %0 = arith.cmpi eq, %arg1, %c0_i32 : i32
    %1 = arith.extui %0 : i1 to i32
    %c0_i32_0 = arith.constant 0 : i32
    %2 = arith.cmpi ne, %1, %c0_i32_0 : i32
    scf.if %2 {
      %cst_10 = arith.constant 0.000000e+00 : f32
      %12 = vector.broadcast %cst_10 : f32 to vector<16x128xf32>
      %c0_11 = arith.constant 0 : index
      %c0_12 = arith.constant 0 : index
      %13 = vector.load %arg7[%c0_11, %c0_12] : memref<16x128xf32, #tpu.memory_space<vmem>>, vector<16x128xf32>
      tpu.vector_store %arg7[%c0_11, %c0_12], %12 {strides = array<i32>} : memref<16x128xf32, #tpu.memory_space<vmem>>, vector<16x128xf32>,
    } else {
    }
    %c0 = arith.constant 0 : index
    %c0_1 = arith.constant 0 : index
    %3 = vector.load %arg7[%c0, %c0_1] : memref<16x128xf32, #tpu.memory_space<vmem>>, vector<16x128xf32>
    %c0_2 = arith.constant 0 : index
    %c0_3 = arith.constant 0 : index
    %4 = vector.load %arg2[%c0_2, %c0_3] : memref<16x32xbf16, #tpu.memory_space<vmem>>, vector<16x32xbf16>
    %c0_4 = arith.constant 0 : index
    %c0_5 = arith.constant 0 : index
    %5 = vector.load %arg3[%c0_4, %c0_5] : memref<32x128xbf16, #tpu.memory_space<vmem>>, vector<32x128xbf16>
    %cst = arith.constant dense<0.000000e+00> : vector<16x128xf32>
    %6 = tpu.matmul %4, %5, %cst {dimension_numbers = #tpu.dot_dimension_numbers<[1], [0], [0], [1], [0, 0, 1, 1], [], []>} : vector<16x32xbf16>, vector<32x128xbf16>, vector<16x128xf32> -> vector<16x128xf32>
    %7 = arith.addf %3, %6 : vector<16x128xf32>
    %c0_6 = arith.constant 0 : index
    %c0_7 = arith.constant 0 : index
    %8 = vector.load %arg7[%c0_6, %c0_7] : memref<16x128xf32, #tpu.memory_space<vmem>>, vector<16x128xf32>
    tpu.vector_store %arg7[%c0_6, %c0_7], %7 {strides = array<i32>} : memref<16x128xf32, #tpu.memory_space<vmem>>, vector<16x128xf32>,
    %c0_i32_8 = arith.constant 0 : i32
    %9 = arith.cmpi eq, %arg1, %c0_i32_8 : i32
    %10 = arith.extui %9 : i1 to i32
    %c0_i32_9 = arith.constant 0 : i32
    %11 = arith.cmpi ne, %10, %c0_i32_9 : i32
    scf.if %11 {
      %c0_10 = arith.constant 0 : index
      %c0_11 = arith.constant 0 : index
      %12 = vector.load %arg7[%c0_10, %c0_11] : memref<16x128xf32, #tpu.memory_space<vmem>>, vector<16x128xf32>
      %c0_12 = arith.constant 0 : index
      %c0_13 = arith.constant 0 : index
      %13 = vector.load %arg5[%c0_12, %c0_13] : memref<16x1xf32, #tpu.memory_space<vmem>>, vector<16x1xf32>
      %14 = vector.broadcast %13 : vector<16x1xf32> to vector<16x128xf32>
      %15 = arith.mulf %12, %14 : vector<16x128xf32>
      %c0_14 = arith.constant 0 : index
      %c0_15 = arith.constant 0 : index
      %16 = vector.load %arg4[%c0_14, %c0_15] : memref<16x128xf32, #tpu.memory_space<vmem>>, vector<16x128xf32>
      %17 = arith.addf %15, %16 : vector<16x128xf32>
      %cst_16 = arith.constant 0.000000e+00 : f32
      %18 = vector.broadcast %cst_16 : f32 to vector<16x128xf32>
      %19 = arith.cmpf ogt, %17, %18 : vector<16x128xf32>
      %cst_17 = arith.constant 0.000000e+00 : f32
      %20 = vector.broadcast %cst_17 : f32 to vector<16x128xf32>
      %21 = arith.minimumf %17, %20 : vector<16x128xf32>
      %22 = math.exp %21 : vector<16x128xf32>
      %cst_18 = arith.constant 1.000000e+00 : f32
      %23 = vector.broadcast %cst_18 : f32 to vector<16x128xf32>
      %24 = arith.subf %22, %23 : vector<16x128xf32>
      %25 = arith.select %19, %17, %24 : vector<16x128xi1>, vector<16x128xf32>
      %26 = arith.truncf %25 : vector<16x128xf32> to vector<16x128xbf16>
      %c0_19 = arith.constant 0 : index
      %c0_20 = arith.constant 0 : index
      %27 = vector.load %arg6[%c0_19, %c0_20] : memref<16x128xbf16, #tpu.memory_space<vmem>>, vector<16x128xbf16>
      tpu.vector_store %arg6[%c0_19, %c0_20], %26 {strides = array<i32>} : memref<16x128xbf16, #tpu.memory_space<vmem>>, vector<16x128xbf16>,
    } else {
    }
    return
  }
  func.func @transform_0(%arg0: i32, %arg1: i32) -> (i32, i32) {
    %c0_i32 = arith.constant 0 : i32
    return %arg0, %arg1 : i32, i32
  }
  func.func @transform_1(%arg0: i32, %arg1: i32) -> (i32, i32) {
    %c0_i32 = arith.constant 0 : i32
    %c0_i32_0 = arith.constant 0 : i32
    return %arg1, %c0_i32 : i32, i32
  }
  func.func @transform_2(%arg0: i32, %arg1: i32) -> (i32, i32) {
    %c0_i32 = arith.constant 0 : i32
    %c0_i32_0 = arith.constant 0 : i32
    return %arg0, %c0_i32 : i32, i32
  }
  func.func @transform_3(%arg0: i32, %arg1: i32) -> (i32, i32) {
    %c0_i32 = arith.constant 0 : i32
    %c0_i32_0 = arith.constant 0 : i32
    return %arg0, %c0_i32 : i32, i32
  }
  func.func @transform_4(%arg0: i32, %arg1: i32) -> (i32, i32) {
    %c0_i32 = arith.constant 0 : i32
    %c0_i32_0 = arith.constant 0 : i32
    return %arg0, %c0_i32 : i32, i32
  }
}

</mosaic_0001>

<bundles_post_ra>
// kernel: spline_cnn_forward.7
= control target key start
LH: loop header
LB: loop body
LE: loop exit
PB: predicated region body
PF: predicated region fallthrough
CT: control target
= control target key end

     0   :  { %v182_v0 = vmov 0.0   ;;  %vm183_vm0 = vmmov 0   ;;  %v184_v2 = vmov 0   ;;  %vm49_vm1 = vcmask 261120   ;;  %s237_s1 = inlined_call_operand.vmem [shape: bf16[32,128], index: 1, kind: input, shape index: {}]   ;;  %s238_s3 = inlined_call_operand.vmem [shape: f32[16,1], index: 3, kind: input, shape index: {}]   ;;  %s239_s0 = inlined_call_operand.vmem [shape: bf16[16,32], index: 0, kind: input, shape index: {}]   ;;  %s240_s2 = inlined_call_operand.vmem [shape: f32[16,128], index: 2, kind: input, shape index: {}]   ;;  %s241_s4 = inlined_call_operand.vmem [shape: f32[16,128], index: 4, kind: output, shape index: {}]  }
   0x1   :  { %159 = vmatprep.subr.bf16.mxu0 %v182_v0  ;;  %v171_v1 = vld [vmem:[%s237_s1] sm:$0xff]   ;;  %163 = vmatprep.mubr.msk.bf16.mxu0 %vm183_vm0, %v182_v0  ;;  %v172_v3 = vld [vmem:[%s237_s1 + $0x8] sm:$0xff]   ;;  %v121_v7 = vlaneseq }
   0x2   :  { %170 = vset.pattern.permute.xlu0 %v184_v2  ;;  %160 = vmatpush3.bf16.msra.mxu0 %v171_v1  ;;  %v103_v4 = vld [vmem:[%s238_s3] sm:$0xff]  ;;  %v104_v6 = vld [vmem:[%s238_s3 + $0x8] sm:$0xff] }
   0x3   :  { %161 = vmatprep.subr.bf16.mxu0 %v182_v0  ;;  %107 = vperm.xlu0 %170, %v103_v4   ;;  %v173_v5 = vld [vmem:[%s239_s0] sm:$0xff]   ;;  %v122_v9 = vand.u32 127, %v121_v7  ;;  %v118_v16 = vld [vmem:[%s240_s2 + $0x8] sm:$0xff] }
   0x4   :  { %v117_v11 = vld [vmem:[%s240_s2] sm:$0xff] }
   0x5   :  { %vm123_vm2 = vcmp.lt.s32.totalorder %v122_v9, 4 }
   0x6   :  { %162 = vmatpush3.bf16.msra.mxu0 %v172_v3 }
   0x7   :  { %112 = vperm.xlu0 %170, %v104_v6  }
   0x9   :  { %164 = vmatmul.mubr.msk.bf16.vlgmr.msra.gmra.mrb[0].mxu0 %vm49_vm1, %v173_v5 }
  0x82   :  { %v108_v8 = vpop.permute.xlu0 %107 }
  0x86   :  { %v113_v14 = vpop.permute.xlu0 %112 }
  0xdc   :  { %v87_v10 = vpop.f32.mrb[0].mxu0 }
  0xdd   :  { %v115_v12 = vmul.f32 %v108_v8, %v87_v10  ;;  %v165_v13 = vpop.f32.mrb[1].mxu0 }
  0xde   :  { %v90_v15 = vpop.f32.mrb[2].mxu0 }
  0xdf   :  { %v116_v17 = vmul.f32 %v113_v14, %v90_v15  ;;  %v166_v18 = vpop.f32.mrb[3].mxu0  ;;  %v119_v19 = vadd.f32 %v117_v11, %v115_v12 }
  0xe1   :  { %v124_v20 = vsel %vm123_vm2, %v119_v19, -1e+30  ;;  %v120_v21 = vadd.f32 %v118_v16, %v116_v17 }
  0xe2   :  { %126 = vmax.xlane.f32.xlu1 %v124_v20 }
  0xe3   :  { %v125_v22 = vsel %vm123_vm2, %v120_v21, -1e+30 }
  0xe6   :  { %128 = vmax.xlane.f32.xlu1 %v125_v22 }
 0x16f   :  { %v127_v23 = vpop.xlane.xlu1 %126 }
 0x170   :  { %v130_v24 = vsub.f32 %v124_v20, %v127_v23 }
 0x172   :  { %v132_v25 = vmul.f32 1.442695, %v130_v24 }
 0x173   :  { %v129_v26 = vpop.xlane.xlu1 %128 }
 0x174   :  { %174 = vpow2.f32 %v132_v25  ;;  %v131_v27 = vsub.f32 %v125_v22, %v129_v26 }
 0x176   :  { %v134_v28 = vmul.f32 1.442695, %v131_v27 }
 0x178   :  { %176 = vpow2.f32 %v134_v28 }
 0x17e   :  { %v175_v29 = vpop.eup %174 }
 0x17f   :  { %136 = vadd.xlane.f32.xlu0 %v175_v29 }
 0x182   :  { %v177_v30 = vpop.eup %176 }
 0x183   :  { %138 = vadd.xlane.f32.xlu1 %v177_v30 }
 0x20c   :  { %v137_v31 = vpop.xlane.xlu0 %136 }
 0x20d   :  { %178 = vlog2.f32 %v137_v31 }
 0x210   :  { %v139_v32 = vpop.xlane.xlu1 %138 }
 0x211   :  { %180 = vlog2.f32 %v139_v32 }
 0x217   :  { %v179_v33 = vpop.eup %178 }
 0x218   :  { %v141_v34 = vmul.f32 0.6931472, %v179_v33 }
 0x21a   :  { %v144_v35 = vsub.f32 %v130_v24, %v141_v34 }
 0x21b   :  { %v181_v36 = vpop.eup %180 }
 0x21c   :  { %146 = vst [vmem:[%s241_s4] sm:$0xff] %v144_v35  ;;  %v143_v37 = vmul.f32 0.6931472, %v181_v36 }
 0x21e   :  { %v145_v38 = vsub.f32 %v131_v27, %v143_v37 }
 0x220   :  { %147 = vst [vmem:[%s241_s4 + $0x8] sm:$0xff] %v145_v38 }

// kernel: spline_cnn_forward.4
= control target key start
LH: loop header
LB: loop body
LE: loop exit
PB: predicated region body
PF: predicated region fallthrough
CT: control target
= control target key end

     0   :  { %v421_v0 = vmov 0.0   ;;  %vm422_vm0 = vmmov 0   ;;  %v423_v3 = vmov 0   ;;  %s539_s1 = inlined_call_operand.vmem [shape: bf16[128,384], index: 1, kind: input, shape index: {}]   ;;  %s540_s0 = inlined_call_operand.vmem [shape: bf16[16,128], index: 0, kind: input, shape index: {}]   ;;  %s541_s2 = inlined_call_operand.vmem [shape: f32[1,128], index: 2, kind: input, shape index: {}]   ;;  %s542_s4 = inlined_call_operand.vmem [shape: f32[16,128], index: 4, kind: output, shape index: {1}]   ;;  %s543_s3 = inlined_call_operand.vmem [shape: bf16[2,16,128], index: 3, kind: output, shape index: {0}]  }
   0x1   :  { %365 = vmatprep.subr.bf16.mxu1 %v421_v0  ;;  %v388_v1 = vld [vmem:[%s539_s1 + $0x4] ss:$12 sps:$4 sm:$0xff]   ;;  %381 = vmatprep.mubr.msk.bf16.mxu1 %vm422_vm0, %v421_v0  ;;  %v390_v2 = vld [vmem:[%s539_s1 + $0x8] ss:$12 sps:$4 sm:$0xff]   ;;  %v391_v4 = vld [vmem:[%s539_s1] ss:$12 sps:$4 sm:$0xff]  }
   0x2   :  { %217 = vmatprep.mubr.bf16.mxu0 %v423_v3  ;;  %185 = vmatprep.subr.bf16.mxu0 %v388_v1  ;;  %v392_v5 = vld [vmem:[%s539_s1 + $0x1c] ss:$12 sps:$4 sm:$0xff]   ;;  %v394_v6 = vld [vmem:[%s539_s1 + $0x20] ss:$12 sps:$4 sm:$0xff]   ;;  %v395_v7 = vld [vmem:[%s539_s1 + $0x18] ss:$12 sps:$4 sm:$0xff]  }
   0x3   :  { %366 = vmatpush3.bf16.msra.mxu1 %v390_v2  ;;  %186 = vmatpush1.bf16.msra.mxu0 %v391_v4  ;;  %v396_v8 = vld [vmem:[%s539_s1 + $0x34] ss:$12 sps:$4 sm:$0xff]   ;;  %v398_v9 = vld [vmem:[%s539_s1 + $0x38] ss:$12 sps:$4 sm:$0xff]   ;;  %v399_v10 = vld [vmem:[%s539_s1 + $0x30] ss:$12 sps:$4 sm:$0xff]  }
   0x4   :  { %367 = vmatprep.subr.bf16.mxu1 %v421_v0  ;;  %187 = vmatprep.subr.bf16.mxu0 %v392_v5  ;;  %v400_v11 = vld [vmem:[%s539_s1 + $0x4c] ss:$12 sps:$4 sm:$0xff]   ;;  %v402_v12 = vld [vmem:[%s539_s1 + $0x50] ss:$12 sps:$4 sm:$0xff]   ;;  %v403_v13 = vld [vmem:[%s539_s1 + $0x48] ss:$12 sps:$4 sm:$0xff]  }
   0x5   :  { %v404_v14 = vld [vmem:[%s539_s1 + $0x64] ss:$12 sps:$4 sm:$0xff]   ;;  %v406_v15 = vld [vmem:[%s539_s1 + $0x68] ss:$12 sps:$4 sm:$0xff]   ;;  %v407_v16 = vld [vmem:[%s539_s1 + $0x60] ss:$12 sps:$4 sm:$0xff]  }
   0x6   :  { %v408_v17 = vld [vmem:[%s539_s1 + $0x7c] ss:$12 sps:$4 sm:$0xff]   ;;  %v410_v18 = vld [vmem:[%s539_s1 + $0x80] ss:$12 sps:$4 sm:$0xff]   ;;  %v411_v19 = vld [vmem:[%s539_s1 + $0x78] ss:$12 sps:$4 sm:$0xff]  }
   0x7   :  { %368 = vmatpush3.bf16.msra.mxu1 %v394_v6  ;;  %188 = vmatpush1.bf16.msra.mxu0 %v395_v7  ;;  %v412_v20 = vld [vmem:[%s539_s1 + $0x94] ss:$12 sps:$4 sm:$0xff]   ;;  %v414_v21 = vld [vmem:[%s539_s1 + $0x98] ss:$12 sps:$4 sm:$0xff]   ;;  %v415_v22 = vld [vmem:[%s539_s1 + $0x90] ss:$12 sps:$4 sm:$0xff]  }
   0x8   :  { %369 = vmatprep.subr.bf16.mxu1 %v421_v0  ;;  %189 = vmatprep.subr.bf16.mxu0 %v396_v8  ;;  %v416_v23 = vld [vmem:[%s539_s1 + $0xac] ss:$12 sps:$4 sm:$0xff]   ;;  %v418_v24 = vld [vmem:[%s539_s1 + $0xb0] ss:$12 sps:$4 sm:$0xff]   ;;  %v419_v25 = vld [vmem:[%s539_s1 + $0xa8] ss:$12 sps:$4 sm:$0xff]  }
   0x9   :  { %v420_v26 = vld [vmem:[%s540_s0] sm:$0xff]  }
   0xa   :  { %v340_v27 = vld [vmem:[%s541_s2] ss:$0 sm:$0xff] }
   0xb   :  { %370 = vmatpush3.bf16.msra.mxu1 %v398_v9  ;;  %190 = vmatpush1.bf16.msra.mxu0 %v399_v10 }
   0xc   :  { %371 = vmatprep.subr.bf16.mxu1 %v421_v0  ;;  %191 = vmatprep.subr.bf16.mxu0 %v400_v11 }
   0xf   :  { %372 = vmatpush3.bf16.msra.mxu1 %v402_v12  ;;  %192 = vmatpush1.bf16.msra.mxu0 %v403_v13 }
  0x10   :  { %373 = vmatprep.subr.bf16.mxu1 %v421_v0  ;;  %193 = vmatprep.subr.bf16.mxu0 %v404_v14 }
  0x13   :  { %374 = vmatpush3.bf16.msra.mxu1 %v406_v15  ;;  %194 = vmatpush1.bf16.msra.mxu0 %v407_v16 }
  0x14   :  { %375 = vmatprep.subr.bf16.mxu1 %v421_v0  ;;  %195 = vmatprep.subr.bf16.mxu0 %v408_v17 }
  0x17   :  { %376 = vmatpush3.bf16.msra.mxu1 %v410_v18  ;;  %196 = vmatpush1.bf16.msra.mxu0 %v411_v19 }
  0x18   :  { %377 = vmatprep.subr.bf16.mxu1 %v421_v0  ;;  %197 = vmatprep.subr.bf16.mxu0 %v412_v20 }
  0x1b   :  { %378 = vmatpush3.bf16.msra.mxu1 %v414_v21  ;;  %198 = vmatpush1.bf16.msra.mxu0 %v415_v22 }
  0x1c   :  { %379 = vmatprep.subr.bf16.mxu1 %v421_v0  ;;  %199 = vmatprep.subr.bf16.mxu0 %v416_v23 }
  0x1f   :  { %380 = vmatpush3.bf16.msra.mxu1 %v418_v24  ;;  %200 = vmatpush1.bf16.msra.mxu0 %v419_v25 }
  0x22   :  { %382 = vmatmul.mubr.bf16.vlgmr.msra.gmra.mrb[0].mxu1 %v420_v26  ;;  %218 = vmatmul.mubr.bf16.vlgmr.msra.gmra.mrb[0].mxu0 %v420_v26 }
  0xf5   :  { %v262_v28 = vpop.f32.mrb[0].mxu1  ;;  %v219_v30 = vpop.f32.mrb[0].mxu0 }
  0xf6   :  { %v297_v29 = vadd.f32 %v340_v27, %v262_v28  ;;  %v383_v31 = vpop.f32.mrb[1].mxu1  ;;  %v221_v32 = vpop.f32.mrb[1].mxu0 }
  0xf7   :  { %v265_v33 = vpop.f32.mrb[2].mxu1  ;;  %v223_v35 = vpop.f32.mrb[2].mxu0 }
  0xf8   :  { %299 = vst [vmem:[%s542_s4] sm:$0xff] %v297_v29  ;;  %v298_v34 = vadd.f32 %v340_v27, %v265_v33  ;;  %v384_v36 = vpop.f32.mrb[3].mxu1  ;;  %v348_v37 = vpack.c.bf16 %v223_v35, %v219_v30  ;;  %v225_v38 = vpop.f32.mrb[3].mxu0 }
  0xf9   :  { %v353_v39 = vpack.c.bf16 %v225_v38, %v221_v32 }
  0xfa   :  { %300 = vst [vmem:[%s542_s4 + $0x8] sm:$0xff] %v298_v34  ;;  %349 = vst [vmem:[%s543_s3] sm:$0xff] %v348_v37  }
  0xfb   :  { %355 = vst [vmem:[%s543_s3 + $0x8] sm:$0xff] %v353_v39  }

// kernel: spline_cnn_forward.5
= control target key start
LH: loop header
LB: loop body
LE: loop exit
PB: predicated region body
PF: predicated region fallthrough
CT: control target
= control target key end

     0   :  { %v184_v0 = vmov 0.0   ;;  %vm185_vm0 = vmmov 0   ;;  %v186_v2 = vmov 0   ;;  %vm49_vm1 = vcmask 261120   ;;  %s236_s1 = inlined_call_operand.vmem [shape: bf16[32,128], index: 1, kind: input, shape index: {}]   ;;  %s237_s3 = inlined_call_operand.vmem [shape: f32[16,1], index: 3, kind: input, shape index: {}]   ;;  %s238_s0 = inlined_call_operand.vmem [shape: bf16[16,32], index: 0, kind: input, shape index: {}]   ;;  %s239_s2 = inlined_call_operand.vmem [shape: f32[16,128], index: 2, kind: input, shape index: {}]   ;;  %s240_s4 = inlined_call_operand.vmem [shape: bf16[16,128], index: 4, kind: output, shape index: {}]  }
   0x1   :  { %165 = vmatprep.subr.bf16.mxu0 %v184_v0  ;;  %v177_v1 = vld [vmem:[%s236_s1] sm:$0xff]   ;;  %169 = vmatprep.mubr.msk.bf16.mxu0 %vm185_vm0, %v184_v0  ;;  %v178_v3 = vld [vmem:[%s236_s1 + $0x8] sm:$0xff]  }
   0x2   :  { %176 = vset.pattern.permute.xlu0 %v186_v2  ;;  %166 = vmatpush3.bf16.msra.mxu0 %v177_v1  ;;  %v103_v4 = vld [vmem:[%s237_s3] sm:$0xff]  ;;  %v104_v6 = vld [vmem:[%s237_s3 + $0x8] sm:$0xff] }
   0x3   :  { %167 = vmatprep.subr.bf16.mxu0 %v184_v0  ;;  %107 = vperm.xlu0 %176, %v103_v4   ;;  %v179_v5 = vld [vmem:[%s238_s0] sm:$0xff]   ;;  %v118_v14 = vld [vmem:[%s239_s2 + $0x8] sm:$0xff] }
   0x4   :  { %v117_v9 = vld [vmem:[%s239_s2] sm:$0xff] }
   0x6   :  { %168 = vmatpush3.bf16.msra.mxu0 %v178_v3 }
   0x7   :  { %112 = vperm.xlu0 %176, %v104_v6  }
   0x9   :  { %170 = vmatmul.mubr.msk.bf16.vlgmr.msra.gmra.mrb[0].mxu0 %vm49_vm1, %v179_v5 }
  0x82   :  { %v108_v7 = vpop.permute.xlu0 %107 }
  0x86   :  { %v113_v12 = vpop.permute.xlu0 %112 }
  0xdc   :  { %v87_v8 = vpop.f32.mrb[0].mxu0 }
  0xdd   :  { %v115_v10 = vmul.f32 %v108_v7, %v87_v8  ;;  %v171_v11 = vpop.f32.mrb[1].mxu0 }
  0xde   :  { %v90_v13 = vpop.f32.mrb[2].mxu0 }
  0xdf   :  { %v119_v15 = vadd.f32 %v117_v9, %v115_v10  ;;  %v116_v16 = vmul.f32 %v113_v12, %v90_v13  ;;  %v172_v17 = vpop.f32.mrb[3].mxu0 }
  0xe1   :  { %v123_v18 = vmin.f32 %v119_v15, 0.0  ;;  %v120_v19 = vadd.f32 %v118_v14, %v116_v16  ;;  %vm121_vm2 = vcmp.gt.f32.partialorder %v119_v15, 0.0 }
  0xe3   :  { %v125_v20 = vmul.f32 1.442695, %v123_v18  ;;  %v124_v21 = vmin.f32 %v120_v19, 0.0  ;;  %vm122_vm3 = vcmp.gt.f32.partialorder %v120_v19, 0.0 }
  0xe5   :  { %180 = vpow2.f32 %v125_v20  ;;  %v127_v22 = vmul.f32 1.442695, %v124_v21 }
  0xe7   :  { %182 = vpow2.f32 %v127_v22 }
  0xef   :  { %v181_v23 = vpop.eup %180 }
  0xf0   :  { %v151_v24 = vadd.f32 -1.0, %v181_v23 }
  0xf1   :  { %v183_v25 = vpop.eup %182 }
  0xf2   :  { %v152_v26 = vadd.f32 -1.0, %v183_v25  ;;  %v131_v27 = vsel %vm121_vm2, %v119_v15, %v151_v24 }
  0xf4   :  { %v132_v28 = vsel %vm122_vm3, %v120_v19, %v152_v26 }
  0xf5   :  { %v160_v29 = vpack.c.bf16 %v132_v28, %v131_v27 }
  0xf7   :  { %161 = vst [vmem:[%s240_s4] sm:$0xff] %v160_v29  }

</bundles_post_ra>
